<compile_context>
chip_gen: v5e
topology: v5e:2x2
jax: 0.10.0
libtpu: 0.0.40
codegen_flags: <defaults>
</compile_context>

<pallas_src>
import jax
import jax.numpy as jnp
from jax.experimental import pallas as pl
from jax.experimental.pallas import tpu as pltpu

BN_EPS = 1e-5
LRELU_SLOPE = 0.01          # torch.nn.functional.leaky_relu default
K_IN = 333
K_PAD = 384                 # 333 padded to the next multiple of 128
MAX_BATCH = 4096            # training-mode BN keeps the full batch in VMEM


def _bn_lrelu(h, gamma, beta, inv_n_row):
    """Training-mode BatchNorm1d + leaky_relu with batch stats on the MXU.

    mean and (centered) variance are computed as (1,N) @ (N,C) matmuls so the
    axis-0 reductions use the MXU instead of VPU/XLU sublane reductions.
    Centered variance E[(h-mean)^2] avoids the E[h^2]-E[h]^2 cancellation;
    biased variance matches torch's normalization statistic.  The centered
    activations d are reused for the normalization:
        hn = (h - mean) * gamma * rsqrt(var + eps) + beta
    All BN / leaky_relu elementwise math stays f32.
    """
    mean = jnp.dot(inv_n_row, h, preferred_element_type=jnp.float32)     # (1, C)
    d = h - mean
    var = jnp.dot(inv_n_row, d * d, preferred_element_type=jnp.float32)  # (1, C)
    scale = gamma * jax.lax.rsqrt(var + BN_EPS)
    hn = d * scale + beta
    return jnp.maximum(hn, LRELU_SLOPE * hn)        # leaky_relu


def reverse_net_kernel(
    x_ref,                       # (N, 333) f32
    w3_ref, g3_ref, be3_ref,     # (384, 32) bf16, (1, 32) f32, (1, 32) f32
    w2_ref, g2_ref, be2_ref,     # (32, 64)  bf16, (1, 64) f32, (1, 64) f32
    w1_ref, g1_ref, be1_ref,     # (64, 128) bf16, (1, 128) f32, (1, 128) f32
    wo_ref, nbo_ref,             # (128, 64) bf16, (1, 64) f32 (negated bias)
    out_ref,                     # (N, 64) int32
    xp_ref,                      # scratch: (N, 384) bf16, zero-padded x
):
    n = x_ref.shape[0]
    # (1, N) row of 1/N shared by every BN layer (hoisted splat constant).
    inv_n_row = jnp.full((1, n), 1.0 / n, dtype=jnp.float32)

    # Stage x into the zero-padded bf16 tile in VMEM (cast + pad in-kernel so
    # the wrapper does no extra HBM pass over x).  Zero-fill first so stale
    # VMEM bits (possibly NaN) can never leak into the padded columns.
    xp_ref[...] = jnp.zeros_like(xp_ref)
    xp_ref[:, :K_IN] = x_ref[...].astype(jnp.bfloat16)

    # fc3 -> bn3 -> leaky_relu   (fc3 bias omitted: cancelled by batch-stat BN)
    h = jnp.dot(xp_ref[...], w3_ref[...], preferred_element_type=jnp.float32)
    h = _bn_lrelu(h, g3_ref[...], be3_ref[...], inv_n_row)

    # fc2 -> bn2 -> leaky_relu
    h = jnp.dot(h.astype(jnp.bfloat16), w2_ref[...],
                preferred_element_type=jnp.float32)
    h = _bn_lrelu(h, g2_ref[...], be2_ref[...], inv_n_row)

    # fc1 -> bn1 -> leaky_relu
    h = jnp.dot(h.astype(jnp.bfloat16), w1_ref[...],
                preferred_element_type=jnp.float32)
    h = _bn_lrelu(h, g1_ref[...], be1_ref[...], inv_n_row)

    # output -> sigmoid -> round -> int.  sigmoid is monotone with
    # sigmoid(0) = 0.5 and round() is half-to-even (0.5 -> 0), so the tail is a
    # strict sign test on (logits + bo), i.e. logits > -bo: the output bias is
    # folded into the threshold and the broadcasted add is dropped.
    o = jnp.dot(h.astype(jnp.bfloat16), wo_ref[...],
                preferred_element_type=jnp.float32)
    out_ref[...] = (o > nbo_ref[...]).astype(jnp.int32)


def reverse_net(x, params):
    """x: (N, 333) float32.  Returns (N, 64) int32 in {0, 1}.

    Training-mode BatchNorm needs the whole batch resident in one VMEM block,
    and (like torch) N must be >= 2.  `.squeeze()` of the reference module is
    a no-op for N > 1.
    """
    n = x.shape[0]
    assert x.shape[1] == K_IN
    assert 2 <= n <= MAX_BATCH, "batch must fit the single-block training-mode BN kernel"

    ordered = [
        x,
        params["w3t"], params["g3"], params["be3"],
        params["w2t"], params["g2"], params["be2"],
        params["w1t"], params["g1"], params["be1"],
        params["wot"], params["nbo"],
    ]
    vmem = pl.BlockSpec(memory_space=pltpu.MemorySpace.VMEM)

    return pl.pallas_call(
        reverse_net_kernel,
        in_specs=[vmem] * len(ordered),
        out_specs=vmem,
        out_shape=jax.ShapeDtypeStruct((n, 64), jnp.int32),
        scratch_shapes=[pltpu.VMEM((n, K_PAD), jnp.bfloat16)],
        compiler_params=pltpu.CompilerParams(
            # Footprint at the MAX_BATCH cap is ~20 MiB; 32 MiB leaves headroom
            # on v7x's 64 MiB physical VMEM (harmless on v5e / v6e).
            vmem_limit_bytes=32 * 1024 * 1024,
        ),
    )(*ordered)


def init_params(key):
    """Synthetic init mirroring the PyTorch layer shapes.

    Linear weights: uniform(-1/sqrt(fan_in), 1/sqrt(fan_in)) (torch default
    scale), stored transposed as (in, out), pre-cast to bf16 (w3 additionally
    pre-padded to 384 rows) so the jitted wrapper does no per-call converts.
    BatchNorm gamma=1, beta=0.  b3/b2/b1 are omitted entirely: they are
    exactly cancelled by the training-mode BatchNorm following each layer.
    The output bias is stored negated (nbo) as the sign-test threshold.
    """
    def linear(key, fan_in, fan_out, with_bias):
        kw, kb = jax.random.split(key)
        bound = 1.0 / jnp.sqrt(float(fan_in))
        w_t = jax.random.uniform(kw, (fan_in, fan_out), jnp.float32, -bound, bound)
        if not with_bias:
            return w_t, None
        b = jax.random.uniform(kb, (1, fan_out), jnp.float32, -bound, bound)
        return w_t, b

    k3, k2, k1, ko = jax.random.split(key, 4)
    w3t, _ = linear(k3, K_IN, 32, with_bias=False)
    w2t, _ = linear(k2, 32, 64, with_bias=False)
    w1t, _ = linear(k1, 64, 128, with_bias=False)
    wot, bo = linear(ko, 128, 64, with_bias=True)

    # One-time layout/dtype prep, kept out of the per-call jitted wrapper.
    w3t = jnp.pad(w3t, ((0, K_PAD - K_IN), (0, 0))).astype(jnp.bfloat16)
    w2t = w2t.astype(jnp.bfloat16)
    w1t = w1t.astype(jnp.bfloat16)
    wot = wot.astype(jnp.bfloat16)
    nbo = -bo                         # negated output bias (f32)

    def bn(c):
        return jnp.ones((1, c), jnp.float32), jnp.zeros((1, c), jnp.float32)

    g3, be3 = bn(32)
    g2, be2 = bn(64)
    g1, be1 = bn(128)

    return dict(
        w3t=w3t, g3=g3, be3=be3,
        w2t=w2t, g2=g2, be2=be2,
        w1t=w1t, g1=g1, be1=be1,
        wot=wot, nbo=nbo,
    )


if __name__ == "__main__":
    key = jax.random.PRNGKey(0)
    k_param, k_x = jax.random.split(key)

    params = init_params(k_param)
    x = jax.random.normal(k_x, (8, K_IN), jnp.float32)   # batch=8, features=333

    run = jax.jit(reverse_net)
    out = run(x, params)
    out = jax.block_until_ready(out)

    assert out.shape == (8, 64) and out.dtype == jnp.int32
    assert bool(jnp.all((out == 0) | (out == 1)))        # sigmoid+round -> {0, 1}
    print("KERNEL_OK")
</pallas_src>

<mosaic_0001>
module attributes {stable_mosaic.version = 11 : i64} {
  func.func @reverse_net_kernel(%arg0: memref<8x333xf32, #tpu.memory_space<vmem>>, %arg1: memref<384x32xbf16, #tpu.memory_space<vmem>>, %arg2: memref<1x32xf32, #tpu.memory_space<vmem>>, %arg3: memref<1x32xf32, #tpu.memory_space<vmem>>, %arg4: memref<32x64xbf16, #tpu.memory_space<vmem>>, %arg5: memref<1x64xf32, #tpu.memory_space<vmem>>, %arg6: memref<1x64xf32, #tpu.memory_space<vmem>>, %arg7: memref<64x128xbf16, #tpu.memory_space<vmem>>, %arg8: memref<1x128xf32, #tpu.memory_space<vmem>>, %arg9: memref<1x128xf32, #tpu.memory_space<vmem>>, %arg10: memref<128x64xbf16, #tpu.memory_space<vmem>>, %arg11: memref<1x64xf32, #tpu.memory_space<vmem>>, %arg12: memref<8x64xi32, #tpu.memory_space<vmem>>, %arg13: memref<8x384xbf16, #tpu.memory_space<vmem>>) attributes {dimension_semantics = [], scalar_prefetch = 0 : i64, scratch_operands = 1 : i64, tpu.core_type = #tpu.core_type<tc>} {
    %cst = arith.constant 1.250000e-01 : f32
    %0 = vector.broadcast %cst : f32 to vector<1x8xf32>
    %cst_0 = arith.constant 0.000000e+00 : bf16
    %1 = vector.broadcast %cst_0 : bf16 to vector<8x384xbf16>
    %c0 = arith.constant 0 : index
    %c0_1 = arith.constant 0 : index
    %2 = vector.load %arg13[%c0, %c0_1] : memref<8x384xbf16, #tpu.memory_space<vmem>>, vector<8x384xbf16>
    tpu.vector_store %arg13[%c0, %c0_1], %1 {strides = array<i32>} : memref<8x384xbf16, #tpu.memory_space<vmem>>, vector<8x384xbf16>,
    %c0_2 = arith.constant 0 : index
    %c0_3 = arith.constant 0 : index
    %3 = vector.load %arg0[%c0_2, %c0_3] : memref<8x333xf32, #tpu.memory_space<vmem>>, vector<8x333xf32>
    %4 = arith.truncf %3 : vector<8x333xf32> to vector<8x333xbf16>
    %c0_4 = arith.constant 0 : index
    %c0_5 = arith.constant 0 : index
    %5 = vector.load %arg13[%c0_4, %c0_5] : memref<8x384xbf16, #tpu.memory_space<vmem>>, vector<8x333xbf16>
    tpu.vector_store %arg13[%c0_4, %c0_5], %4 {strides = array<i32>} : memref<8x384xbf16, #tpu.memory_space<vmem>>, vector<8x333xbf16>,
    %c0_6 = arith.constant 0 : index
    %c0_7 = arith.constant 0 : index
    %6 = vector.load %arg13[%c0_6, %c0_7] : memref<8x384xbf16, #tpu.memory_space<vmem>>, vector<8x384xbf16>
    %c0_8 = arith.constant 0 : index
    %c0_9 = arith.constant 0 : index
    %7 = vector.load %arg1[%c0_8, %c0_9] : memref<384x32xbf16, #tpu.memory_space<vmem>>, vector<384x32xbf16>
    %cst_10 = arith.constant dense<0.000000e+00> : vector<8x32xf32>
    %8 = tpu.matmul %6, %7, %cst_10 {dimension_numbers = #tpu.dot_dimension_numbers<[1], [0], [0], [1], [0, 0, 1, 1], [], []>} : vector<8x384xbf16>, vector<384x32xbf16>, vector<8x32xf32> -> vector<8x32xf32>
    %c0_11 = arith.constant 0 : index
    %c0_12 = arith.constant 0 : index
    %9 = vector.load %arg2[%c0_11, %c0_12] : memref<1x32xf32, #tpu.memory_space<vmem>>, vector<1x32xf32>
    %c0_13 = arith.constant 0 : index
    %c0_14 = arith.constant 0 : index
    %10 = vector.load %arg3[%c0_13, %c0_14] : memref<1x32xf32, #tpu.memory_space<vmem>>, vector<1x32xf32>
    %cst_15 = arith.constant dense<0.000000e+00> : vector<1x32xf32>
    %11 = tpu.matmul %0, %8, %cst_15 {dimension_numbers = #tpu.dot_dimension_numbers<[1], [0], [0], [1], [0, 0, 1, 1], [], []>} : vector<1x8xf32>, vector<8x32xf32>, vector<1x32xf32> -> vector<1x32xf32>
    %12 = vector.broadcast %11 : vector<1x32xf32> to vector<8x32xf32>
    %13 = arith.subf %8, %12 : vector<8x32xf32>
    %14 = arith.mulf %13, %13 : vector<8x32xf32>
    %cst_16 = arith.constant dense<0.000000e+00> : vector<1x32xf32>
    %15 = tpu.matmul %0, %14, %cst_16 {dimension_numbers = #tpu.dot_dimension_numbers<[1], [0], [0], [1], [0, 0, 1, 1], [], []>} : vector<1x8xf32>, vector<8x32xf32>, vector<1x32xf32> -> vector<1x32xf32>
    %cst_17 = arith.constant 9.99999974E-6 : f32
    %16 = vector.broadcast %cst_17 : f32 to vector<1x32xf32>
    %17 = arith.addf %15, %16 : vector<1x32xf32>
    %18 = math.rsqrt %17 : vector<1x32xf32>
    %19 = arith.mulf %9, %18 : vector<1x32xf32>
    %20 = vector.broadcast %19 : vector<1x32xf32> to vector<8x32xf32>
    %21 = arith.mulf %13, %20 : vector<8x32xf32>
    %22 = vector.broadcast %10 : vector<1x32xf32> to vector<8x32xf32>
    %23 = arith.addf %21, %22 : vector<8x32xf32>
    %cst_18 = arith.constant 0.00999999977 : f32
    %24 = vector.broadcast %cst_18 : f32 to vector<8x32xf32>
    %25 = arith.mulf %24, %23 : vector<8x32xf32>
    %26 = arith.maximumf %23, %25 : vector<8x32xf32>
    %27 = arith.truncf %26 : vector<8x32xf32> to vector<8x32xbf16>
    %c0_19 = arith.constant 0 : index
    %c0_20 = arith.constant 0 : index
    %28 = vector.load %arg4[%c0_19, %c0_20] : memref<32x64xbf16, #tpu.memory_space<vmem>>, vector<32x64xbf16>
    %cst_21 = arith.constant dense<0.000000e+00> : vector<8x64xf32>
    %29 = tpu.matmul %27, %28, %cst_21 {dimension_numbers = #tpu.dot_dimension_numbers<[1], [0], [0], [1], [0, 0, 1, 1], [], []>} : vector<8x32xbf16>, vector<32x64xbf16>, vector<8x64xf32> -> vector<8x64xf32>
    %c0_22 = arith.constant 0 : index
    %c0_23 = arith.constant 0 : index
    %30 = vector.load %arg5[%c0_22, %c0_23] : memref<1x64xf32, #tpu.memory_space<vmem>>, vector<1x64xf32>
    %c0_24 = arith.constant 0 : index
    %c0_25 = arith.constant 0 : index
    %31 = vector.load %arg6[%c0_24, %c0_25] : memref<1x64xf32, #tpu.memory_space<vmem>>, vector<1x64xf32>
    %cst_26 = arith.constant dense<0.000000e+00> : vector<1x64xf32>
    %32 = tpu.matmul %0, %29, %cst_26 {dimension_numbers = #tpu.dot_dimension_numbers<[1], [0], [0], [1], [0, 0, 1, 1], [], []>} : vector<1x8xf32>, vector<8x64xf32>, vector<1x64xf32> -> vector<1x64xf32>
    %33 = vector.broadcast %32 : vector<1x64xf32> to vector<8x64xf32>
    %34 = arith.subf %29, %33 : vector<8x64xf32>
    %35 = arith.mulf %34, %34 : vector<8x64xf32>
    %cst_27 = arith.constant dense<0.000000e+00> : vector<1x64xf32>
    %36 = tpu.matmul %0, %35, %cst_27 {dimension_numbers = #tpu.dot_dimension_numbers<[1], [0], [0], [1], [0, 0, 1, 1], [], []>} : vector<1x8xf32>, vector<8x64xf32>, vector<1x64xf32> -> vector<1x64xf32>
    %cst_28 = arith.constant 9.99999974E-6 : f32
    %37 = vector.broadcast %cst_28 : f32 to vector<1x64xf32>
    %38 = arith.addf %36, %37 : vector<1x64xf32>
    %39 = math.rsqrt %38 : vector<1x64xf32>
    %40 = arith.mulf %30, %39 : vector<1x64xf32>
    %41 = vector.broadcast %40 : vector<1x64xf32> to vector<8x64xf32>
    %42 = arith.mulf %34, %41 : vector<8x64xf32>
    %43 = vector.broadcast %31 : vector<1x64xf32> to vector<8x64xf32>
    %44 = arith.addf %42, %43 : vector<8x64xf32>
    %cst_29 = arith.constant 0.00999999977 : f32
    %45 = vector.broadcast %cst_29 : f32 to vector<8x64xf32>
    %46 = arith.mulf %45, %44 : vector<8x64xf32>
    %47 = arith.maximumf %44, %46 : vector<8x64xf32>
    %48 = arith.truncf %47 : vector<8x64xf32> to vector<8x64xbf16>
    %c0_30 = arith.constant 0 : index
    %c0_31 = arith.constant 0 : index
    %49 = vector.load %arg7[%c0_30, %c0_31] : memref<64x128xbf16, #tpu.memory_space<vmem>>, vector<64x128xbf16>
    %cst_32 = arith.constant dense<0.000000e+00> : vector<8x128xf32>
    %50 = tpu.matmul %48, %49, %cst_32 {dimension_numbers = #tpu.dot_dimension_numbers<[1], [0], [0], [1], [0, 0, 1, 1], [], []>} : vector<8x64xbf16>, vector<64x128xbf16>, vector<8x128xf32> -> vector<8x128xf32>
    %c0_33 = arith.constant 0 : index
    %c0_34 = arith.constant 0 : index
    %51 = vector.load %arg8[%c0_33, %c0_34] : memref<1x128xf32, #tpu.memory_space<vmem>>, vector<1x128xf32>
    %c0_35 = arith.constant 0 : index
    %c0_36 = arith.constant 0 : index
    %52 = vector.load %arg9[%c0_35, %c0_36] : memref<1x128xf32, #tpu.memory_space<vmem>>, vector<1x128xf32>
    %cst_37 = arith.constant dense<0.000000e+00> : vector<1x128xf32>
    %53 = tpu.matmul %0, %50, %cst_37 {dimension_numbers = #tpu.dot_dimension_numbers<[1], [0], [0], [1], [0, 0, 1, 1], [], []>} : vector<1x8xf32>, vector<8x128xf32>, vector<1x128xf32> -> vector<1x128xf32>
    %54 = vector.broadcast %53 : vector<1x128xf32> to vector<8x128xf32>
    %55 = arith.subf %50, %54 : vector<8x128xf32>
    %56 = arith.mulf %55, %55 : vector<8x128xf32>
    %cst_38 = arith.constant dense<0.000000e+00> : vector<1x128xf32>
    %57 = tpu.matmul %0, %56, %cst_38 {dimension_numbers = #tpu.dot_dimension_numbers<[1], [0], [0], [1], [0, 0, 1, 1], [], []>} : vector<1x8xf32>, vector<8x128xf32>, vector<1x128xf32> -> vector<1x128xf32>
    %cst_39 = arith.constant 9.99999974E-6 : f32
    %58 = vector.broadcast %cst_39 : f32 to vector<1x128xf32>
    %59 = arith.addf %57, %58 : vector<1x128xf32>
    %60 = math.rsqrt %59 : vector<1x128xf32>
    %61 = arith.mulf %51, %60 : vector<1x128xf32>
    %62 = vector.broadcast %61 : vector<1x128xf32> to vector<8x128xf32>
    %63 = arith.mulf %55, %62 : vector<8x128xf32>
    %64 = vector.broadcast %52 : vector<1x128xf32> to vector<8x128xf32>
    %65 = arith.addf %63, %64 : vector<8x128xf32>
    %cst_40 = arith.constant 0.00999999977 : f32
    %66 = vector.broadcast %cst_40 : f32 to vector<8x128xf32>
    %67 = arith.mulf %66, %65 : vector<8x128xf32>
    %68 = arith.maximumf %65, %67 : vector<8x128xf32>
    %69 = arith.truncf %68 : vector<8x128xf32> to vector<8x128xbf16>
    %c0_41 = arith.constant 0 : index
    %c0_42 = arith.constant 0 : index
    %70 = vector.load %arg10[%c0_41, %c0_42] : memref<128x64xbf16, #tpu.memory_space<vmem>>, vector<128x64xbf16>
    %cst_43 = arith.constant dense<0.000000e+00> : vector<8x64xf32>
    %71 = tpu.matmul %69, %70, %cst_43 {dimension_numbers = #tpu.dot_dimension_numbers<[1], [0], [0], [1], [0, 0, 1, 1], [], []>} : vector<8x128xbf16>, vector<128x64xbf16>, vector<8x64xf32> -> vector<8x64xf32>
    %c0_44 = arith.constant 0 : index
    %c0_45 = arith.constant 0 : index
    %72 = vector.load %arg11[%c0_44, %c0_45] : memref<1x64xf32, #tpu.memory_space<vmem>>, vector<1x64xf32>
    %73 = vector.broadcast %72 : vector<1x64xf32> to vector<8x64xf32>
    %74 = arith.cmpf ogt, %71, %73 : vector<8x64xf32>
    %75 = arith.extui %74 : vector<8x64xi1> to vector<8x64xi32>
    %c0_46 = arith.constant 0 : index
    %c0_47 = arith.constant 0 : index
    %76 = vector.load %arg12[%c0_46, %c0_47] : memref<8x64xi32, #tpu.memory_space<vmem>>, vector<8x64xi32>
    tpu.vector_store %arg12[%c0_46, %c0_47], %75 {strides = array<i32>} : memref<8x64xi32, #tpu.memory_space<vmem>>, vector<8x64xi32>,
    return
  }
}

</mosaic_0001>

<bundles_post_ra>
// kernel: reverse_net.1
= control target key start
LH: loop header
LB: loop body
LE: loop exit
PB: predicated region body
PF: predicated region fallthrough
CT: control target
= control target key end

     0   :  { %v921_v3 = vmov 0   ;;  %vm51_vm0 = vcmask 625664   ;;  %s1152_s0 = inlined_call_operand.vmem [shape: f32[8,333], index: 0, kind: input, shape index: {}]   ;;  %s1153_s1 = inlined_call_operand.vmem [shape: bf16[384,32], index: 1, kind: input, shape index: {}]   ;;  %s1154_s2 = inlined_call_operand.vmem [shape: f32[1,32], index: 2, kind: input, shape index: {}]   ;;  %s1155_s3 = inlined_call_operand.vmem [shape: f32[1,32], index: 3, kind: input, shape index: {}]   ;;  %s1156_s4 = inlined_call_operand.vmem [shape: bf16[32,64], index: 4, kind: input, shape index: {}]   ;;  %s1157_s5 = inlined_call_operand.vmem [shape: f32[1,64], index: 5, kind: input, shape index: {}]   ;;  %s1158_s6 = inlined_call_operand.vmem [shape: f32[1,64], index: 6, kind: input, shape index: {}]   ;;  %s1159_s7 = inlined_call_operand.vmem [shape: bf16[64,128], index: 7, kind: input, shape index: {}]   ;;  %s1160_s8 = inlined_call_operand.vmem [shape: f32[1,128], index: 8, kind: input, shape index: {}]   ;;  %s1161_s9 = inlined_call_operand.vmem [shape: f32[1,128], index: 9, kind: input, shape index: {}]   ;;  %s1162_s10 = inlined_call_operand.vmem [shape: bf16[128,64], index: 10, kind: input, shape index: {}]   ;;  %s1163_s11 = inlined_call_operand.vmem [shape: f32[1,64], index: 11, kind: input, shape index: {}]   ;;  %s1164_s12 = inlined_call_operand.hbm [shape: s32[8,64], index: 12, kind: output, shape index: {}]  }
   0x1   :  { %v851_v0 = vld [vmem:[%s1153_s1 + $0x38] sm:$0xff]  ;;  %44 = vst [vmem:[#allocation2 + $0x8] sm:$0xf] %v921_v3  ;;  %v850_v4 = vld [vmem:[%s1153_s1 + $0x30] sm:$0xff]  ;;  %v849_v7 = vld [vmem:[%s1153_s1 + $0x28] sm:$0xff] }
   0x2   :  { %v859_v1 = vld [vmem:[%s1153_s1 + $0x78] sm:$0xff]  ;;  %258 = vmatpush.bf16.msra.mxu0 %v851_v0  ;;  %v858_v5 = vld [vmem:[%s1153_s1 + $0x70] sm:$0xff]  ;;  %v857_v8 = vld [vmem:[%s1153_s1 + $0x68] sm:$0xff] }
   0x3   :  { %v867_v2 = vld [vmem:[%s1153_s1 + $0xb8] sm:$0xff]  ;;  %271 = vmatpush.bf16.msra.mxu1 %v859_v1  ;;  %v866_v6 = vld [vmem:[%s1153_s1 + $0xb0] sm:$0xff]  ;;  %v865_v9 = vld [vmem:[%s1153_s1 + $0xa8] sm:$0xff] }
   0x4   :  { %284 = vmatpush.bf16.msra.mxu2 %v867_v2  ;;  %v848_v10 = vld [vmem:[%s1153_s1 + $0x20] sm:$0xff]  ;;  %v46_v12 = vld [vmem:[%s1152_s0 + $0x8] sm:$0xff]  ;;  %v47_v13 = vld [vmem:[%s1152_s0 + $0x10] sm:$0xff] }
   0x5   :  { %v45_v11 = vld [vmem:[%s1152_s0] sm:$0xff]  ;;  %v49_v15 = vpack.c.bf16 %v47_v13, %v47_v13 }
   0x6   :  { %259 = vmatpush.bf16.msra.mxu0 %v850_v4  ;;  %v48_v14 = vpack.c.bf16 %v46_v12, %v45_v11  ;;  %v856_v16 = vld [vmem:[%s1153_s1 + $0x60] sm:$0xff] }
   0x7   :  { %272 = vmatpush.bf16.msra.mxu1 %v858_v5 }
   0x8   :  { %285 = vmatpush.bf16.msra.mxu2 %v866_v6 }
   0xa   :  { %260 = vmatpush.bf16.msra.mxu0 %v849_v7 }
   0xb   :  { %273 = vmatpush.bf16.msra.mxu1 %v857_v8 }
   0xc   :  { %17 = vsyncpa [#allocation4], 0  ;;  %286 = vmatpush.bf16.msra.mxu2 %v865_v9  ;;  %v864_v17 = vld [vmem:[%s1153_s1 + $0xa0] sm:$0xff]  ;;  %52 = vst.msk [vmem:[#allocation2 + $0x8] sm:$0xf] %vm51_vm0, %v49_v15  ;;  %v847_v18 = vld [vmem:[%s1153_s1 + $0x18] sm:$0xff]  ;;  %v105_v28 = vunpack.c.l.b16 %v48_v14  ;;  %v106_v29 = vunpack.c.h.b16 %v48_v14 }
   0xd   :  { %v855_v19 = vld [vmem:[%s1153_s1 + $0x58] sm:$0xff]  ;;  %v846_v21 = vld [vmem:[%s1153_s1 + $0x10] sm:$0xff]  ;;  %v845_v24 = vld [vmem:[%s1153_s1 + $0x8] sm:$0xff]  ;;  %vm299_vm1 = vcmask 64512   ;;  %v922_v44 = vmov 0.125   ;;  %vm384_vm5 = vcmask 261120  }
   0xe   :  { %261 = vmatpush.bf16.msra.mxu0 %v848_v10  ;;  %v863_v20 = vld [vmem:[%s1153_s1 + $0x98] sm:$0xff]  ;;  %v854_v22 = vld [vmem:[%s1153_s1 + $0x50] sm:$0xff]  ;;  %v853_v25 = vld [vmem:[%s1153_s1 + $0x48] sm:$0xff]  ;;  %v108_v34 = vpack.c.b16 %v105_v28, %v105_v28  ;;  %v109_v35 = vpack.c.b16 %v106_v29, %v106_v29  ;;  %vm500_vm9 = vcmask 523264  }
   0xf   :  { %274 = vmatpush.bf16.msra.mxu1 %v856_v16  ;;  %v862_v23 = vld [vmem:[%s1153_s1 + $0x90] sm:$0xff]  ;;  %v861_v26 = vld [vmem:[%s1153_s1 + $0x88] sm:$0xff]  ;;  %v844_v30 = vld [vmem:[%s1153_s1] sm:$0xff] }
  0x10   :  { %287 = vmatpush.bf16.msra.mxu2 %v864_v17  ;;  %v852_v31 = vld [vmem:[%s1153_s1 + $0x40] sm:$0xff]  ;;  %v869_v50 = vld [vmem:[%s1156_s4 + $0x8] sm:$0xff]  ;;  %v873_v13 = vld [vmem:[%s1159_s7 + $0x18] sm:$0xff] }
  0x11   :  { %v860_v33 = vld [vmem:[%s1153_s1 + $0x80] sm:$0xff]  ;;  %v872_v14 = vld [vmem:[%s1159_s7 + $0x10] sm:$0xff]  ;;  %v871_v15 = vld [vmem:[%s1159_s7 + $0x8] sm:$0xff] }
  0x12   :  { %262 = vmatpush.bf16.msra.mxu0 %v847_v18  ;;  %v868_v51 = vld [vmem:[%s1156_s4] sm:$0xff] }
  0x13   :  { %275 = vmatpush.bf16.msra.mxu1 %v855_v19  ;;  %v54_v27 = vld [vmem:[#allocation2 + $0x8] sm:$0xf]  ;;  %v297_v59 = vld [vmem:[%s1154_s2] sm:$0x1] }
  0x14   :  { %288 = vmatpush.bf16.msra.mxu2 %v863_v20  ;;  %v107_v32 = vunpack.c.l.b16 %v54_v27  ;;  %v885_v0 = vld [vmem:[%s1155_s3] ss:$0 sm:$0xff] }
  0x15   :  { %v870_v16 = vld [vmem:[%s1159_s7] sm:$0xff]  ;;  %s675_s7 = sshll.u32 %s1164_s12, 4  ;;  %s676_s7 = int_to_ptr.hbm [resolvable:$true] %s675_s7 }
  0x16   :  { %263 = vmatpush.bf16.msra.mxu0 %v846_v21  ;;  %v110_v36 = vpack.c.b16 %v107_v32, %v107_v32  ;;  %v886_v29 = vld [vmem:[%s1158_s6] ss:$0 sm:$0xff] }
  0x17   :  { %276 = vmatpush.bf16.msra.mxu1 %v854_v22 }
  0x18   :  { %289 = vmatpush.bf16.msra.mxu2 %v862_v23 }
  0x1a   :  { %264 = vmatpush.bf16.msra.mxu0 %v845_v24  ;;  %v401_v24 = vld [vmem:[%s1157_s5] sm:$0x1] }
  0x1b   :  { %277 = vmatpush.bf16.msra.mxu1 %v853_v25 }
  0x1c   :  { %290 = vmatpush.bf16.msra.mxu2 %v861_v26 }
  0x1e   :  { %265 = vmatpush.bf16.msra.mxu0 %v844_v30 }
  0x1f   :  { %278 = vmatpush.bf16.msra.mxu1 %v852_v31 }
  0x20   :  { %291 = vmatpush.bf16.msra.mxu2 %v860_v33 }
  0x21   :  { %266 = vmatmul.bf16.vlgmr.msra.gmra.mxu0 %v108_v34 }
  0x22   :  { %279 = vmatmul.bf16.vlgmr.msra.gmra.mxu1 %v109_v35  ;;  %508 = vmatpush.bf16.msrb.mxu0 %v873_v13 }
  0x23   :  { %292 = vmatmul.bf16.vlgmr.msra.gmra.mxu2 %v110_v36  ;;  %394 = vmatpush.bf16.msrb.mxu1 %v869_v50 }
  0x26   :  { %509 = vmatpush.bf16.msrb.mxu0 %v872_v14 }
  0x27   :  { %395 = vmatpush.bf16.msrb.mxu1 %v868_v51 }
  0x2a   :  { %510 = vmatpush.bf16.msrb.mxu0 %v871_v15 }
  0x2e   :  { %511 = vmatpush.bf16.msrb.mxu0 %v870_v16 }
  0x9e   :  { %v267_v37 = vpop.f32.mrf.mxu0 }
  0x9f   :  { %v280_v38 = vpop.f32.mrf.mxu1 }
  0xa0   :  { %v281_v39 = vadd.f32 %v280_v38, %v267_v37 }
  0xa6   :  { %v293_v40 = vpop.f32.mrf.mxu2  ;;  %v269_v42 = vpop.f32.mrf.mxu0 }
  0xa7   :  { %v294_v41 = vadd.f32 %v293_v40, %v281_v39  ;;  %v282_v43 = vpop.f32.mrf.mxu1  ;;  %v880_v42 = vld [vmem:[%s1162_s10 + $0x30] sm:$0xff] }
  0xa8   :  { %v879_v43 = vld [vmem:[%s1162_s10 + $0x28] sm:$0xff] }
  0xa9   :  { %318 = vmatpush.msrb.mxu2 %v294_v41 }
  0xaa   :  { %780 = vmatmul.msk.f32.vlgmr.msrb.gmra.mxu2 %vm299_vm1, %v922_v44 }
  0xae   :  { %v295_v45 = vpop.f32.mrf.mxu2 }
  0xaf   :  { %v878_v45 = vld [vmem:[%s1162_s10 + $0x20] sm:$0xff] }
 0x12d   :  { %v320_v46 = vpop.f32.mrf.mxu2 }
 0x12e   :  { %v323_v47 = vperm.slane %v320_v46, 0  ;;  %v876_v46 = vld [vmem:[%s1162_s10 + $0x10] sm:$0xff] }
 0x130   :  { %v324_v48 = vsub.f32 %v294_v41, %v323_v47  ;;  %v881_v41 = vld [vmem:[%s1162_s10 + $0x38] sm:$0xff]  ;;  %v875_v47 = vld [vmem:[%s1162_s10 + $0x8] sm:$0xff] }
 0x132   :  { %v325_v49 = vmul.f32 %v324_v48, %v324_v48 }
 0x134   :  { %341 = vmatpush.msra.mxu3 %v325_v49 }
 0x135   :  { %781 = vmatmul.msk.f32.vlgmr.msra.gmra.mxu3 %vm299_vm1, %v922_v44 }
 0x1b8   :  { %v343_v52 = vpop.f32.mrf.mxu3 }
 0x1b9   :  { %v344_v53 = vadd.f32 1e-05, %v343_v52 }
 0x1bb   :  { %889 = vrsqrt.f32 %v344_v53  ;;  %vm352_vm3 = vweird.f32 %v344_v53 }
 0x1c1   :  { %v890_v54 = vpop.eup %889 }
 0x1c2   :  { %v347_v55 = vmul.f32 %v890_v54, %v344_v53  ;;  %vm353_vm2 = vweird.f32 %v890_v54 }
 0x1c3   :  { %vm354_vm4 = vmor %vm352_vm3, %vm353_vm2 }
 0x1c4   :  { %v348_v56 = vmul.f32 %v890_v54, %v347_v55 }
 0x1c6   :  { %v349_v57 = vmul.f32 0.5, %v348_v56  ;;  %v517_v56 = vld [vmem:[%s1160_s8] sm:$0x1]  ;;  %s923_s8 = smov [#allocation3]  }
 0x1c7   :  { %s673_s30 = sshll.u32 %s923_s8, 4  ;;  %s674_s30 = int_to_ptr.vmem [resolvable:$true] %s673_s30 }
 0x1c8   :  { %v350_v58 = vsub.f32 1.5, %v349_v57 }
 0x1ca   :  { %v351_v60 = vmul.f32 %v890_v54, %v350_v58 }
 0x1cc   :  { %v355_v61 = vsel %vm354_vm4, %v890_v54, %v351_v60 }
 0x1cd   :  { %v356_v62 = vmul.f32 %v355_v61, %v297_v59  ;;  %v887_v61 = vld [vmem:[%s1161_s9] ss:$0 sm:$0xff] }
 0x1cf   :  { %v358_v63 = vperm.slane %v356_v62, 0 }
 0x1d1   :  { %v360_v1 = vmul.f32 %v358_v63, %v324_v48  ;;  %v874_v48 = vld [vmem:[%s1162_s10] sm:$0xff] }
 0x1d3   :  { %v364_v2 = vadd.f32 %v885_v0, %v360_v1 }
 0x1d5   :  { %v365_v4 = vmul.f32 0.01, %v364_v2 }
 0x1d7   :  { %v366_v5 = vmax.f32 %v364_v2, %v365_v4  ;;  %v888_v4 = vld [vmem:[%s1163_s11] ss:$0 sm:$0xff] }
 0x1d9   :  { %v367_v6 = vpack.c.bf16 %v366_v5, %v366_v5 }
 0x1db   :  { %790 = vmatmul.msk.bf16.vlgmr.msrb.gmra.mxu1 %vm384_vm5, %v367_v6 }
 0x258   :  { %v397_v7 = vpop.f32.mrf.mxu1 }
 0x259   :  { %418 = vmatpush.msrb.mxu3 %v397_v7 }
 0x25a   :  { %791 = vmatmul.msk.f32.vlgmr.msrb.gmra.mxu3 %vm299_vm1, %v922_v44 }
 0x260   :  { %v399_v8 = vpop.f32.mrf.mxu1 }
 0x2dd   :  { %v420_v9 = vpop.f32.mrf.mxu3 }
 0x2de   :  { %v423_v10 = vperm.slane %v420_v9, 0 }
 0x2e0   :  { %v424_v11 = vsub.f32 %v397_v7, %v423_v10 }
 0x2e2   :  { %v425_v12 = vmul.f32 %v424_v11, %v424_v11 }
 0x2e4   :  { %441 = vmatpush.msra.mxu3 %v425_v12 }
 0x2e5   :  { %792 = vmatmul.msk.f32.vlgmr.msra.gmra.mxu3 %vm299_vm1, %v922_v44 }
 0x2e6   :  { %648 = vmatpush.bf16.msrb.mxu3 %v881_v41 }
 0x2ea   :  { %649 = vmatpush.bf16.msrb.mxu3 %v880_v42 }
 0x2ee   :  { %650 = vmatpush.bf16.msrb.mxu3 %v879_v43 }
 0x2f2   :  { %651 = vmatpush.bf16.msrb.mxu3 %v878_v45 }
 0x368   :  { %v443_v17 = vpop.f32.mrf.mxu3 }
 0x369   :  { %v444_v18 = vadd.f32 1e-05, %v443_v17 }
 0x36b   :  { %891 = vrsqrt.f32 %v444_v18  ;;  %vm452_vm7 = vweird.f32 %v444_v18 }
 0x371   :  { %v892_v19 = vpop.eup %891 }
 0x372   :  { %v447_v20 = vmul.f32 %v892_v19, %v444_v18  ;;  %vm453_vm6 = vweird.f32 %v892_v19 }
 0x373   :  { %vm454_vm8 = vmor %vm452_vm7, %vm453_vm6 }
 0x374   :  { %v448_v21 = vmul.f32 %v892_v19, %v447_v20 }
 0x376   :  { %v449_v22 = vmul.f32 0.5, %v448_v21 }
 0x378   :  { %v450_v23 = vsub.f32 1.5, %v449_v22 }
 0x37a   :  { %v451_v25 = vmul.f32 %v892_v19, %v450_v23 }
 0x37c   :  { %v455_v26 = vsel %vm454_vm8, %v892_v19, %v451_v25 }
 0x37d   :  { %v456_v27 = vmul.f32 %v455_v26, %v401_v24 }
 0x37f   :  { %v458_v28 = vperm.slane %v456_v27, 0 }
 0x381   :  { %v460_v30 = vmul.f32 %v458_v28, %v424_v11 }
 0x383   :  { %v464_v31 = vadd.f32 %v886_v29, %v460_v30 }
 0x385   :  { %v465_v32 = vmul.f32 0.01, %v464_v31 }
 0x387   :  { %v466_v33 = vmax.f32 %v464_v31, %v465_v32 }
 0x389   :  { %v467_v34 = vpack.c.bf16 %v466_v33, %v466_v33 }
 0x38b   :  { %809 = vmatmul.msk.bf16.vlgmr.msrb.gmra.mxu0 %vm500_vm9, %v467_v34 }
 0x408   :  { %v513_v35 = vpop.f32.mrf.mxu0 }
 0x409   :  { %534 = vmatpush.msra.mxu1 %v513_v35 }
 0x40a   :  { %810 = vmatmul.msk.f32.vlgmr.msra.gmra.mxu1 %vm299_vm1, %v922_v44 }
 0x410   :  { %v515_v36 = vpop.f32.mrf.mxu0 }
 0x487   :  { %v536_v37 = vpop.f32.mrf.mxu1 }
 0x488   :  { %v539_v38 = vperm.slane %v536_v37, 0 }
 0x48a   :  { %v540_v39 = vsub.f32 %v513_v35, %v539_v38 }
 0x48c   :  { %v541_v40 = vmul.f32 %v540_v39, %v540_v39 }
 0x48e   :  { %557 = vmatpush.msra.mxu2 %v541_v40 }
 0x48f   :  { %811 = vmatmul.msk.f32.vlgmr.msra.gmra.mxu2 %vm299_vm1, %v922_v44  ;;  %v877_v44 = vld [vmem:[%s1162_s10 + $0x18] sm:$0xff] }
 0x490   :  { %652 = vmatpush.bf16.msrb.mxu3 %v877_v44 }
 0x494   :  { %653 = vmatpush.bf16.msrb.mxu3 %v876_v46 }
 0x498   :  { %654 = vmatpush.bf16.msrb.mxu3 %v875_v47 }
 0x49c   :  { %655 = vmatpush.bf16.msrb.mxu3 %v874_v48 }
 0x512   :  { %v559_v49 = vpop.f32.mrf.mxu2 }
 0x513   :  { %v560_v50 = vadd.f32 1e-05, %v559_v49 }
 0x515   :  { %893 = vrsqrt.f32 %v560_v50  ;;  %vm568_vm11 = vweird.f32 %v560_v50 }
 0x51b   :  { %v894_v51 = vpop.eup %893 }
 0x51c   :  { %v563_v52 = vmul.f32 %v894_v51, %v560_v50  ;;  %vm569_vm10 = vweird.f32 %v894_v51 }
 0x51d   :  { %vm570_vm12 = vmor %vm568_vm11, %vm569_vm10 }
 0x51e   :  { %v564_v53 = vmul.f32 %v894_v51, %v563_v52 }
 0x520   :  { %v565_v54 = vmul.f32 0.5, %v564_v53 }
 0x522   :  { %v566_v55 = vsub.f32 1.5, %v565_v54 }
 0x524   :  { %v567_v57 = vmul.f32 %v894_v51, %v566_v55 }
 0x526   :  { %v571_v58 = vsel %vm570_vm12, %v894_v51, %v567_v57 }
 0x527   :  { %v572_v59 = vmul.f32 %v571_v58, %v517_v56 }
 0x529   :  { %v574_v60 = vperm.slane %v572_v59, 0 }
 0x52b   :  { %v576_v62 = vmul.f32 %v574_v60, %v540_v39 }
 0x52d   :  { %v580_v63 = vadd.f32 %v887_v61, %v576_v62 }
 0x52f   :  { %v581_v0 = vmul.f32 0.01, %v580_v63 }
 0x531   :  { %v582_v1 = vmax.f32 %v580_v63, %v581_v0 }
 0x533   :  { %v583_v2 = vpack.c.bf16 %v582_v1, %v582_v1 }
 0x535   :  { %656 = vmatmul.bf16.vlgmr.msrb.gmra.mxu3 %v583_v2 }
 0x5b8   :  { %v657_v5 = vpop.f32.mrf.mxu3 }
 0x5b9   :  { %vm665_vm13 = vcmp.gt.f32.partialorder %v657_v5, %v888_v4 }
 0x5ba   :  { %v666_v6 = vsel %vm665_vm13, 1, %v921_v3 }
 0x5bb   :  { %667 = vst.msk [vmem:[#allocation3] sm:$0xff] %vm500_vm9, %v666_v6 }
 0x5bc   :  { %678 = dma.vmem_to_hbm [thread:$0]  %s674_s30, 128, %s676_s7, [#allocation4]  }
 0x5c0   :  { %v659_v7 = vpop.f32.mrf.mxu3 }
 0x5c1   :  { %919 = dma.done.wait [#allocation4], 128  }
 0x5c2   :  { %920 = vsyncadd [#allocation4], 4294967168 }
 0x5c3   :  { %683 = vsyncpa [#allocation4], 1 }

</bundles_post_ra>
